<compile_context>
chip_gen: v6e
topology: v6e:2x2x1
jax: 0.10.0
libtpu: 0.0.40
codegen_flags: <defaults>
</compile_context>

<pallas_src>
import jax
import jax.numpy as jnp
import numpy as np
from jax.experimental import pallas as pl
from jax.experimental.pallas import tpu as pltpu


def encoder_kernel(x_ref, wx_ref, wihT_ref, whhT_ref, bias_ref,
                   xtilde_ref, xenc_ref):
    tb, Tm1, D = x_ref.shape
    H = whhT_ref.shape[0]
    H4 = whhT_ref.shape[1]

    X = x_ref[...].astype(jnp.float32)                       # (tb, Tm1, D)

    # ---- input attention (loop-invariant, computed once) -------------------
    # The h/c terms and the bias `ba` are constant along the softmax axis (d)
    # and cancel exactly under softmax, so alpha depends on X only.
    proj = jnp.sum(X * wx_ref[...], axis=1)                  # (tb, D)
    proj = proj - jnp.max(proj, axis=-1, keepdims=True)
    e = jnp.exp(proj)
    alpha = e / jnp.sum(e, axis=-1, keepdims=True)           # softmax over D

    x_tilde = alpha[:, None, :] * X                          # (tb, Tm1, D)
    xtilde_ref[...] = x_tilde.astype(xtilde_ref.dtype)       # one-shot store

    # ---- x-side LSTM gate contribution for ALL steps in one MXU pass -------
    gx = jnp.dot(x_tilde.reshape(tb * Tm1, D).astype(jnp.bfloat16),
                 wihT_ref[...], preferred_element_type=jnp.float32)
    gx = (gx + bias_ref[...]).reshape(tb, Tm1, H4)           # (tb, Tm1, 4H) f32

    Whh = whhT_ref[...]                                      # (H, 4H) bf16, g cols pre-scaled x2

    # ---- serial LSTM recurrence: per step only h @ WhhT + activations ------
    h = jnp.zeros((tb, H), jnp.float32)
    c = jnp.zeros((tb, H), jnp.float32)
    for t in range(Tm1):                                     # static unroll (Tm1 = 8)
        gates = jnp.dot(h.astype(jnp.bfloat16), Whh,
                        preferred_element_type=jnp.float32) + gx[:, t, :]
        # Single EUP sigmoid pass over all 4H lanes; the g slice was pre-scaled
        # by 2 (weights + bias) so tanh(z) = 2*sigmoid(2z) - 1 falls out.
        sig = jax.nn.sigmoid(gates)
        i_g = sig[:, 0 * H:1 * H]
        f_g = sig[:, 1 * H:2 * H]
        g_g = 2.0 * sig[:, 2 * H:3 * H] - 1.0
        o_g = sig[:, 3 * H:4 * H]
        c = f_g * c + i_g * g_g
        h = o_g * jnp.tanh(c)
        xenc_ref[:, t, :] = h.astype(xenc_ref.dtype)


def encoder_forward(X, params, *, batch_block=8):
    """X: (B, T-1, D) -> (X_tilde (B, T-1, D), X_encoded (B, T-1, H))."""
    B, Tm1, D = X.shape
    H = params["whh"].shape[1]

    # Only the X columns of the attention weight matter inside the kernel:
    # the h/c columns and `ba` are exact no-ops under the row softmax.
    wa = params["wa"].astype(jnp.float32)                    # (1, 2H + Tm1)
    w_x = jnp.broadcast_to(wa[:, 2 * H:].reshape(1, Tm1, 1), (1, Tm1, D))

    # Weight prep outside the hot kernel: transpose to (in, 4H), scale the
    # g-gate columns by 2 (tanh-fuse), pre-add the two biases, bf16-cast the
    # matmul operands (activations stay f32 inside the kernel).
    gate_scale = jnp.concatenate(
        [jnp.ones((2 * H,), jnp.float32),
         jnp.full((H,), 2.0, jnp.float32),
         jnp.ones((H,), jnp.float32)])[None, :]              # (1, 4H)
    wihT = (params["wih"].astype(jnp.float32).T * gate_scale).astype(jnp.bfloat16)
    whhT = (params["whh"].astype(jnp.float32).T * gate_scale).astype(jnp.bfloat16)
    bias = (params["bih"].astype(jnp.float32)
            + params["bhh"].astype(jnp.float32)) * gate_scale  # (1, 4H) f32

    # Batch-parallel grid: each batch row's recurrence is independent.
    tb = B if B <= batch_block else batch_block
    assert B % tb == 0, "batch must divide evenly into the batch tile"
    grid = (B // tb,)

    def full_spec(shape):
        return pl.BlockSpec(shape, lambda b: (0,) * len(shape))

    x_tilde, x_enc = pl.pallas_call(
        encoder_kernel,
        out_shape=(jax.ShapeDtypeStruct((B, Tm1, D), jnp.float32),
                   jax.ShapeDtypeStruct((B, Tm1, H), jnp.float32)),
        grid=grid,
        in_specs=[pl.BlockSpec((tb, Tm1, D), lambda b: (b, 0, 0)),
                  full_spec((1, Tm1, D)),
                  full_spec((D, 4 * H)),
                  full_spec((H, 4 * H)),
                  full_spec((1, 4 * H))],
        out_specs=(pl.BlockSpec((tb, Tm1, D), lambda b: (b, 0, 0)),
                   pl.BlockSpec((tb, Tm1, H), lambda b: (b, 0, 0))),
        compiler_params=pltpu.CompilerParams(
            dimension_semantics=("parallel",),
            vmem_limit_bytes=32 * 1024 * 1024),
    )(X.astype(jnp.float32), w_x, wihT, whhT, bias)

    return x_tilde, x_enc


def encoder_reference(X, params):
    """Pure-JAX mirror of the PyTorch forward, for correctness checking."""
    B, Tm1, D = X.shape
    H = params["whh"].shape[1]
    wa = params["wa"]
    ba = params["ba"][0, 0]
    h = jnp.zeros((B, H), jnp.float32)
    c = jnp.zeros((B, H), jnp.float32)
    xt_list, xe_list = [], []
    for t in range(Tm1):
        hh = jnp.broadcast_to(h[:, None, :], (B, D, H))
        cc = jnp.broadcast_to(c[:, None, :], (B, D, H))
        xx = jnp.transpose(X, (0, 2, 1))                     # (B, D, Tm1)
        feat = jnp.concatenate([hh, cc, xx], axis=2).reshape(-1, 2 * H + Tm1)
        score = feat @ wa[0] + ba
        alpha = jax.nn.softmax(score.reshape(B, D), axis=-1)
        x_tilde = alpha * X[:, t, :]
        gates = (x_tilde @ params["wih"].T + params["bih"][0]
                 + h @ params["whh"].T + params["bhh"][0])
        i_g = jax.nn.sigmoid(gates[:, :H])
        f_g = jax.nn.sigmoid(gates[:, H:2 * H])
        g_g = jnp.tanh(gates[:, 2 * H:3 * H])
        o_g = jax.nn.sigmoid(gates[:, 3 * H:])
        c = f_g * c + i_g * g_g
        h = o_g * jnp.tanh(c)
        xt_list.append(x_tilde)
        xe_list.append(h)
    return jnp.stack(xt_list, axis=1), jnp.stack(xe_list, axis=1)


if __name__ == "__main__":
    B, T, D, H = 2, 9, 4, 32                                 # batch, T, input_size, hidden
    Tm1 = T - 1

    key = jax.random.PRNGKey(0)
    ks = jax.random.split(key, 6)
    X = jax.random.normal(ks[0], (B, Tm1, D), jnp.float32)
    params = {
        # encoder_attn: Linear(2H + T-1 -> 1)
        "wa": 0.1 * jax.random.normal(ks[1], (1, 2 * H + Tm1), jnp.float32),
        "ba": jnp.full((1, 1), 0.05, jnp.float32),
        # encoder_lstm: LSTM(input_size=D, hidden=H, 1 layer), PyTorch gate order i,f,g,o
        "wih": 0.1 * jax.random.normal(ks[2], (4 * H, D), jnp.float32),
        "whh": 0.1 * jax.random.normal(ks[3], (4 * H, H), jnp.float32),
        "bih": 0.1 * jax.random.normal(ks[4], (1, 4 * H), jnp.float32),
        "bhh": 0.1 * jax.random.normal(ks[5], (1, 4 * H), jnp.float32),
    }

    x_tilde, x_enc = jax.block_until_ready(jax.jit(encoder_forward)(X, params))

    assert x_tilde.shape == (B, Tm1, D)
    assert x_enc.shape == (B, Tm1, H)

    xt_ref, xe_ref = encoder_reference(X, params)
    np.testing.assert_allclose(np.asarray(x_tilde), np.asarray(xt_ref), rtol=2e-2, atol=2e-2)
    np.testing.assert_allclose(np.asarray(x_enc), np.asarray(xe_ref), rtol=2e-2, atol=2e-2)

    print("KERNEL_OK")
</pallas_src>

<mosaic_0001>
module attributes {stable_mosaic.version = 11 : i64} {
  func.func @encoder_kernel(%arg0: i32, %arg1: memref<2x8x4xf32, #tpu.memory_space<vmem>>, %arg2: memref<1x8x4xf32, #tpu.memory_space<vmem>>, %arg3: memref<4x128xbf16, #tpu.memory_space<vmem>>, %arg4: memref<32x128xbf16, #tpu.memory_space<vmem>>, %arg5: memref<1x128xf32, #tpu.memory_space<vmem>>, %arg6: memref<2x8x4xf32, #tpu.memory_space<vmem>>, %arg7: memref<2x8x32xf32, #tpu.memory_space<vmem>>) attributes {dimension_semantics = [#tpu.dimension_semantics<parallel>], iteration_bounds = array<i64: 1>, scalar_prefetch = 0 : i64, scratch_operands = 0 : i64, tpu.core_type = #tpu.core_type<tc>, window_params = [{transform_indices = @transform_0, window_bounds = array<i64: 2, 8, 4>}, {pipeline_mode = #tpu.pipeline_mode<synchronous>, transform_indices = @transform_1, window_bounds = array<i64: 1, 8, 4>}, {pipeline_mode = #tpu.pipeline_mode<synchronous>, transform_indices = @transform_2, window_bounds = array<i64: 4, 128>}, {pipeline_mode = #tpu.pipeline_mode<synchronous>, transform_indices = @transform_3, window_bounds = array<i64: 32, 128>}, {pipeline_mode = #tpu.pipeline_mode<synchronous>, transform_indices = @transform_4, window_bounds = array<i64: 1, 128>}, {transform_indices = @transform_5, window_bounds = array<i64: 2, 8, 4>}, {transform_indices = @transform_6, window_bounds = array<i64: 2, 8, 32>}]} {
    %c0 = arith.constant 0 : index
    %c0_0 = arith.constant 0 : index
    %c0_1 = arith.constant 0 : index
    %0 = vector.load %arg1[%c0, %c0_0, %c0_1] : memref<2x8x4xf32, #tpu.memory_space<vmem>>, vector<2x8x4xf32>
    %c0_2 = arith.constant 0 : index
    %c0_3 = arith.constant 0 : index
    %c0_4 = arith.constant 0 : index
    %1 = vector.load %arg2[%c0_2, %c0_3, %c0_4] : memref<1x8x4xf32, #tpu.memory_space<vmem>>, vector<1x8x4xf32>
    %2 = vector.broadcast %1 : vector<1x8x4xf32> to vector<2x8x4xf32>
    %3 = arith.mulf %0, %2 : vector<2x8x4xf32>
    %cst = arith.constant dense<0.000000e+00> : vector<2x4xf32>
    %4 = vector.multi_reduction <add>, %3, %cst [1] : vector<2x8x4xf32> to vector<2x4xf32>
    %cst_5 = arith.constant dense<0xFF800000> : vector<2xf32>
    %5 = vector.multi_reduction <maximumf>, %4, %cst_5 [1] : vector<2x4xf32> to vector<2xf32>
    %6 = vector.shape_cast %5 : vector<2xf32> to vector<2x1xf32>
    %7 = vector.broadcast %6 : vector<2x1xf32> to vector<2x4xf32>
    %8 = arith.subf %4, %7 : vector<2x4xf32>
    %9 = math.exp %8 : vector<2x4xf32>
    %cst_6 = arith.constant dense<0.000000e+00> : vector<2xf32>
    %10 = vector.multi_reduction <add>, %9, %cst_6 [1] : vector<2x4xf32> to vector<2xf32>
    %11 = vector.shape_cast %10 : vector<2xf32> to vector<2x1xf32>
    %12 = vector.broadcast %11 : vector<2x1xf32> to vector<2x4xf32>
    %13 = arith.divf %9, %12 : vector<2x4xf32>
    %14 = vector.shape_cast %13 : vector<2x4xf32> to vector<2x1x4xf32>
    %15 = vector.broadcast %14 : vector<2x1x4xf32> to vector<2x8x4xf32>
    %16 = arith.mulf %15, %0 : vector<2x8x4xf32>
    %c0_7 = arith.constant 0 : index
    %c0_8 = arith.constant 0 : index
    %c0_9 = arith.constant 0 : index
    %17 = vector.load %arg6[%c0_7, %c0_8, %c0_9] : memref<2x8x4xf32, #tpu.memory_space<vmem>>, vector<2x8x4xf32>
    tpu.vector_store %arg6[%c0_7, %c0_8, %c0_9], %16 {strides = array<i32>} : memref<2x8x4xf32, #tpu.memory_space<vmem>>, vector<2x8x4xf32>,
    %18 = vector.shape_cast %16 : vector<2x8x4xf32> to vector<16x4xf32>
    %19 = arith.truncf %18 : vector<16x4xf32> to vector<16x4xbf16>
    %c0_10 = arith.constant 0 : index
    %c0_11 = arith.constant 0 : index
    %20 = vector.load %arg3[%c0_10, %c0_11] : memref<4x128xbf16, #tpu.memory_space<vmem>>, vector<4x128xbf16>
    %cst_12 = arith.constant dense<0.000000e+00> : vector<16x128xf32>
    %21 = tpu.matmul %19, %20, %cst_12 {dimension_numbers = #tpu.dot_dimension_numbers<[1], [0], [0], [1], [0, 0, 1, 1], [], []>} : vector<16x4xbf16>, vector<4x128xbf16>, vector<16x128xf32> -> vector<16x128xf32>
    %c0_13 = arith.constant 0 : index
    %c0_14 = arith.constant 0 : index
    %22 = vector.load %arg5[%c0_13, %c0_14] : memref<1x128xf32, #tpu.memory_space<vmem>>, vector<1x128xf32>
    %23 = vector.broadcast %22 : vector<1x128xf32> to vector<16x128xf32>
    %24 = arith.addf %21, %23 : vector<16x128xf32>
    %25 = vector.shape_cast %24 : vector<16x128xf32> to vector<2x8x128xf32>
    %c0_15 = arith.constant 0 : index
    %c0_16 = arith.constant 0 : index
    %26 = vector.load %arg4[%c0_15, %c0_16] : memref<32x128xbf16, #tpu.memory_space<vmem>>, vector<32x128xbf16>
    %cst_17 = arith.constant 0.000000e+00 : f32
    %27 = vector.broadcast %cst_17 : f32 to vector<2x32xf32>
    %cst_18 = arith.constant 0.000000e+00 : f32
    %28 = vector.broadcast %cst_18 : f32 to vector<2x32xf32>
    %29 = arith.truncf %27 : vector<2x32xf32> to vector<2x32xbf16>
    %cst_19 = arith.constant dense<0.000000e+00> : vector<2x128xf32>
    %30 = tpu.matmul %29, %26, %cst_19 {dimension_numbers = #tpu.dot_dimension_numbers<[1], [0], [0], [1], [0, 0, 1, 1], [], []>} : vector<2x32xbf16>, vector<32x128xbf16>, vector<2x128xf32> -> vector<2x128xf32>
    %31 = vector.extract_strided_slice %25 {offsets = [0, 0, 0], sizes = [2, 1, 128], strides = [1, 1, 1]} : vector<2x8x128xf32> to vector<2x1x128xf32>
    %32 = vector.shape_cast %31 : vector<2x1x128xf32> to vector<2x128xf32>
    %33 = arith.addf %30, %32 : vector<2x128xf32>
    %34 = arith.negf %33 : vector<2x128xf32>
    %35 = math.exp %34 : vector<2x128xf32>
    %cst_20 = arith.constant 1.000000e+00 : f32
    %36 = vector.broadcast %cst_20 : f32 to vector<2x128xf32>
    %37 = arith.addf %36, %35 : vector<2x128xf32>
    %38 = arith.divf %36, %37 : vector<2x128xf32>
    %39 = vector.extract_strided_slice %38 {offsets = [0, 0], sizes = [2, 32], strides = [1, 1]} : vector<2x128xf32> to vector<2x32xf32>
    %40 = vector.extract_strided_slice %38 {offsets = [0, 32], sizes = [2, 32], strides = [1, 1]} : vector<2x128xf32> to vector<2x32xf32>
    %41 = vector.extract_strided_slice %38 {offsets = [0, 64], sizes = [2, 32], strides = [1, 1]} : vector<2x128xf32> to vector<2x32xf32>
    %cst_21 = arith.constant 2.000000e+00 : f32
    %42 = vector.broadcast %cst_21 : f32 to vector<2x32xf32>
    %43 = arith.mulf %42, %41 : vector<2x32xf32>
    %cst_22 = arith.constant 1.000000e+00 : f32
    %44 = vector.broadcast %cst_22 : f32 to vector<2x32xf32>
    %45 = arith.subf %43, %44 : vector<2x32xf32>
    %46 = vector.extract_strided_slice %38 {offsets = [0, 96], sizes = [2, 32], strides = [1, 1]} : vector<2x128xf32> to vector<2x32xf32>
    %47 = arith.mulf %40, %28 : vector<2x32xf32>
    %48 = arith.mulf %39, %45 : vector<2x32xf32>
    %49 = arith.addf %47, %48 : vector<2x32xf32>
    %50 = math.tanh %49 : vector<2x32xf32>
    %51 = arith.mulf %46, %50 : vector<2x32xf32>
    %c0_23 = arith.constant 0 : index
    %c0_24 = arith.constant 0 : index
    %c0_25 = arith.constant 0 : index
    %52 = vector.load %arg7[%c0_23, %c0_24, %c0_25] : memref<2x8x32xf32, #tpu.memory_space<vmem>>, vector<2x1x32xf32>
    %53 = vector.shape_cast %52 : vector<2x1x32xf32> to vector<2x32xf32>
    %54 = vector.shape_cast %51 : vector<2x32xf32> to vector<2x1x32xf32>
    tpu.vector_store %arg7[%c0_23, %c0_24, %c0_25], %54 {strides = array<i32>} : memref<2x8x32xf32, #tpu.memory_space<vmem>>, vector<2x1x32xf32>,
    %55 = arith.truncf %51 : vector<2x32xf32> to vector<2x32xbf16>
    %cst_26 = arith.constant dense<0.000000e+00> : vector<2x128xf32>
    %56 = tpu.matmul %55, %26, %cst_26 {dimension_numbers = #tpu.dot_dimension_numbers<[1], [0], [0], [1], [0, 0, 1, 1], [], []>} : vector<2x32xbf16>, vector<32x128xbf16>, vector<2x128xf32> -> vector<2x128xf32>
    %57 = vector.extract_strided_slice %25 {offsets = [0, 1, 0], sizes = [2, 1, 128], strides = [1, 1, 1]} : vector<2x8x128xf32> to vector<2x1x128xf32>
    %58 = vector.shape_cast %57 : vector<2x1x128xf32> to vector<2x128xf32>
    %59 = arith.addf %56, %58 : vector<2x128xf32>
    %60 = arith.negf %59 : vector<2x128xf32>
    %61 = math.exp %60 : vector<2x128xf32>
    %cst_27 = arith.constant 1.000000e+00 : f32
    %62 = vector.broadcast %cst_27 : f32 to vector<2x128xf32>
    %63 = arith.addf %62, %61 : vector<2x128xf32>
    %64 = arith.divf %62, %63 : vector<2x128xf32>
    %65 = vector.extract_strided_slice %64 {offsets = [0, 0], sizes = [2, 32], strides = [1, 1]} : vector<2x128xf32> to vector<2x32xf32>
    %66 = vector.extract_strided_slice %64 {offsets = [0, 32], sizes = [2, 32], strides = [1, 1]} : vector<2x128xf32> to vector<2x32xf32>
    %67 = vector.extract_strided_slice %64 {offsets = [0, 64], sizes = [2, 32], strides = [1, 1]} : vector<2x128xf32> to vector<2x32xf32>
    %cst_28 = arith.constant 2.000000e+00 : f32
    %68 = vector.broadcast %cst_28 : f32 to vector<2x32xf32>
    %69 = arith.mulf %68, %67 : vector<2x32xf32>
    %cst_29 = arith.constant 1.000000e+00 : f32
    %70 = vector.broadcast %cst_29 : f32 to vector<2x32xf32>
    %71 = arith.subf %69, %70 : vector<2x32xf32>
    %72 = vector.extract_strided_slice %64 {offsets = [0, 96], sizes = [2, 32], strides = [1, 1]} : vector<2x128xf32> to vector<2x32xf32>
    %73 = arith.mulf %66, %49 : vector<2x32xf32>
    %74 = arith.mulf %65, %71 : vector<2x32xf32>
    %75 = arith.addf %73, %74 : vector<2x32xf32>
    %76 = math.tanh %75 : vector<2x32xf32>
    %77 = arith.mulf %72, %76 : vector<2x32xf32>
    %c0_30 = arith.constant 0 : index
    %c1 = arith.constant 1 : index
    %c0_31 = arith.constant 0 : index
    %78 = vector.load %arg7[%c0_30, %c1, %c0_31] : memref<2x8x32xf32, #tpu.memory_space<vmem>>, vector<2x1x32xf32>
    %79 = vector.shape_cast %78 : vector<2x1x32xf32> to vector<2x32xf32>
    %80 = vector.shape_cast %77 : vector<2x32xf32> to vector<2x1x32xf32>
    tpu.vector_store %arg7[%c0_30, %c1, %c0_31], %80 {strides = array<i32>} : memref<2x8x32xf32, #tpu.memory_space<vmem>>, vector<2x1x32xf32>,
    %81 = arith.truncf %77 : vector<2x32xf32> to vector<2x32xbf16>
    %cst_32 = arith.constant dense<0.000000e+00> : vector<2x128xf32>
    %82 = tpu.matmul %81, %26, %cst_32 {dimension_numbers = #tpu.dot_dimension_numbers<[1], [0], [0], [1], [0, 0, 1, 1], [], []>} : vector<2x32xbf16>, vector<32x128xbf16>, vector<2x128xf32> -> vector<2x128xf32>
    %83 = vector.extract_strided_slice %25 {offsets = [0, 2, 0], sizes = [2, 1, 128], strides = [1, 1, 1]} : vector<2x8x128xf32> to vector<2x1x128xf32>
    %84 = vector.shape_cast %83 : vector<2x1x128xf32> to vector<2x128xf32>
    %85 = arith.addf %82, %84 : vector<2x128xf32>
    %86 = arith.negf %85 : vector<2x128xf32>
    %87 = math.exp %86 : vector<2x128xf32>
    %cst_33 = arith.constant 1.000000e+00 : f32
    %88 = vector.broadcast %cst_33 : f32 to vector<2x128xf32>
    %89 = arith.addf %88, %87 : vector<2x128xf32>
    %90 = arith.divf %88, %89 : vector<2x128xf32>
    %91 = vector.extract_strided_slice %90 {offsets = [0, 0], sizes = [2, 32], strides = [1, 1]} : vector<2x128xf32> to vector<2x32xf32>
    %92 = vector.extract_strided_slice %90 {offsets = [0, 32], sizes = [2, 32], strides = [1, 1]} : vector<2x128xf32> to vector<2x32xf32>
    %93 = vector.extract_strided_slice %90 {offsets = [0, 64], sizes = [2, 32], strides = [1, 1]} : vector<2x128xf32> to vector<2x32xf32>
    %cst_34 = arith.constant 2.000000e+00 : f32
    %94 = vector.broadcast %cst_34 : f32 to vector<2x32xf32>
    %95 = arith.mulf %94, %93 : vector<2x32xf32>
    %cst_35 = arith.constant 1.000000e+00 : f32
    %96 = vector.broadcast %cst_35 : f32 to vector<2x32xf32>
    %97 = arith.subf %95, %96 : vector<2x32xf32>
    %98 = vector.extract_strided_slice %90 {offsets = [0, 96], sizes = [2, 32], strides = [1, 1]} : vector<2x128xf32> to vector<2x32xf32>
    %99 = arith.mulf %92, %75 : vector<2x32xf32>
    %100 = arith.mulf %91, %97 : vector<2x32xf32>
    %101 = arith.addf %99, %100 : vector<2x32xf32>
    %102 = math.tanh %101 : vector<2x32xf32>
    %103 = arith.mulf %98, %102 : vector<2x32xf32>
    %c0_36 = arith.constant 0 : index
    %c2 = arith.constant 2 : index
    %c0_37 = arith.constant 0 : index
    %104 = vector.load %arg7[%c0_36, %c2, %c0_37] : memref<2x8x32xf32, #tpu.memory_space<vmem>>, vector<2x1x32xf32>
    %105 = vector.shape_cast %104 : vector<2x1x32xf32> to vector<2x32xf32>
    %106 = vector.shape_cast %103 : vector<2x32xf32> to vector<2x1x32xf32>
    tpu.vector_store %arg7[%c0_36, %c2, %c0_37], %106 {strides = array<i32>} : memref<2x8x32xf32, #tpu.memory_space<vmem>>, vector<2x1x32xf32>,
    %107 = arith.truncf %103 : vector<2x32xf32> to vector<2x32xbf16>
    %cst_38 = arith.constant dense<0.000000e+00> : vector<2x128xf32>
    %108 = tpu.matmul %107, %26, %cst_38 {dimension_numbers = #tpu.dot_dimension_numbers<[1], [0], [0], [1], [0, 0, 1, 1], [], []>} : vector<2x32xbf16>, vector<32x128xbf16>, vector<2x128xf32> -> vector<2x128xf32>
    %109 = vector.extract_strided_slice %25 {offsets = [0, 3, 0], sizes = [2, 1, 128], strides = [1, 1, 1]} : vector<2x8x128xf32> to vector<2x1x128xf32>
    %110 = vector.shape_cast %109 : vector<2x1x128xf32> to vector<2x128xf32>
    %111 = arith.addf %108, %110 : vector<2x128xf32>
    %112 = arith.negf %111 : vector<2x128xf32>
    %113 = math.exp %112 : vector<2x128xf32>
    %cst_39 = arith.constant 1.000000e+00 : f32
    %114 = vector.broadcast %cst_39 : f32 to vector<2x128xf32>
    %115 = arith.addf %114, %113 : vector<2x128xf32>
    %116 = arith.divf %114, %115 : vector<2x128xf32>
    %117 = vector.extract_strided_slice %116 {offsets = [0, 0], sizes = [2, 32], strides = [1, 1]} : vector<2x128xf32> to vector<2x32xf32>
    %118 = vector.extract_strided_slice %116 {offsets = [0, 32], sizes = [2, 32], strides = [1, 1]} : vector<2x128xf32> to vector<2x32xf32>
    %119 = vector.extract_strided_slice %116 {offsets = [0, 64], sizes = [2, 32], strides = [1, 1]} : vector<2x128xf32> to vector<2x32xf32>
    %cst_40 = arith.constant 2.000000e+00 : f32
    %120 = vector.broadcast %cst_40 : f32 to vector<2x32xf32>
    %121 = arith.mulf %120, %119 : vector<2x32xf32>
    %cst_41 = arith.constant 1.000000e+00 : f32
    %122 = vector.broadcast %cst_41 : f32 to vector<2x32xf32>
    %123 = arith.subf %121, %122 : vector<2x32xf32>
    %124 = vector.extract_strided_slice %116 {offsets = [0, 96], sizes = [2, 32], strides = [1, 1]} : vector<2x128xf32> to vector<2x32xf32>
    %125 = arith.mulf %118, %101 : vector<2x32xf32>
    %126 = arith.mulf %117, %123 : vector<2x32xf32>
    %127 = arith.addf %125, %126 : vector<2x32xf32>
    %128 = math.tanh %127 : vector<2x32xf32>
    %129 = arith.mulf %124, %128 : vector<2x32xf32>
    %c0_42 = arith.constant 0 : index
    %c3 = arith.constant 3 : index
    %c0_43 = arith.constant 0 : index
    %130 = vector.load %arg7[%c0_42, %c3, %c0_43] : memref<2x8x32xf32, #tpu.memory_space<vmem>>, vector<2x1x32xf32>
    %131 = vector.shape_cast %130 : vector<2x1x32xf32> to vector<2x32xf32>
    %132 = vector.shape_cast %129 : vector<2x32xf32> to vector<2x1x32xf32>
    tpu.vector_store %arg7[%c0_42, %c3, %c0_43], %132 {strides = array<i32>} : memref<2x8x32xf32, #tpu.memory_space<vmem>>, vector<2x1x32xf32>,
    %133 = arith.truncf %129 : vector<2x32xf32> to vector<2x32xbf16>
    %cst_44 = arith.constant dense<0.000000e+00> : vector<2x128xf32>
    %134 = tpu.matmul %133, %26, %cst_44 {dimension_numbers = #tpu.dot_dimension_numbers<[1], [0], [0], [1], [0, 0, 1, 1], [], []>} : vector<2x32xbf16>, vector<32x128xbf16>, vector<2x128xf32> -> vector<2x128xf32>
    %135 = vector.extract_strided_slice %25 {offsets = [0, 4, 0], sizes = [2, 1, 128], strides = [1, 1, 1]} : vector<2x8x128xf32> to vector<2x1x128xf32>
    %136 = vector.shape_cast %135 : vector<2x1x128xf32> to vector<2x128xf32>
    %137 = arith.addf %134, %136 : vector<2x128xf32>
    %138 = arith.negf %137 : vector<2x128xf32>
    %139 = math.exp %138 : vector<2x128xf32>
    %cst_45 = arith.constant 1.000000e+00 : f32
    %140 = vector.broadcast %cst_45 : f32 to vector<2x128xf32>
    %141 = arith.addf %140, %139 : vector<2x128xf32>
    %142 = arith.divf %140, %141 : vector<2x128xf32>
    %143 = vector.extract_strided_slice %142 {offsets = [0, 0], sizes = [2, 32], strides = [1, 1]} : vector<2x128xf32> to vector<2x32xf32>
    %144 = vector.extract_strided_slice %142 {offsets = [0, 32], sizes = [2, 32], strides = [1, 1]} : vector<2x128xf32> to vector<2x32xf32>
    %145 = vector.extract_strided_slice %142 {offsets = [0, 64], sizes = [2, 32], strides = [1, 1]} : vector<2x128xf32> to vector<2x32xf32>
    %cst_46 = arith.constant 2.000000e+00 : f32
    %146 = vector.broadcast %cst_46 : f32 to vector<2x32xf32>
    %147 = arith.mulf %146, %145 : vector<2x32xf32>
    %cst_47 = arith.constant 1.000000e+00 : f32
    %148 = vector.broadcast %cst_47 : f32 to vector<2x32xf32>
    %149 = arith.subf %147, %148 : vector<2x32xf32>
    %150 = vector.extract_strided_slice %142 {offsets = [0, 96], sizes = [2, 32], strides = [1, 1]} : vector<2x128xf32> to vector<2x32xf32>
    %151 = arith.mulf %144, %127 : vector<2x32xf32>
    %152 = arith.mulf %143, %149 : vector<2x32xf32>
    %153 = arith.addf %151, %152 : vector<2x32xf32>
    %154 = math.tanh %153 : vector<2x32xf32>
    %155 = arith.mulf %150, %154 : vector<2x32xf32>
    %c0_48 = arith.constant 0 : index
    %c4 = arith.constant 4 : index
    %c0_49 = arith.constant 0 : index
    %156 = vector.load %arg7[%c0_48, %c4, %c0_49] : memref<2x8x32xf32, #tpu.memory_space<vmem>>, vector<2x1x32xf32>
    %157 = vector.shape_cast %156 : vector<2x1x32xf32> to vector<2x32xf32>
    %158 = vector.shape_cast %155 : vector<2x32xf32> to vector<2x1x32xf32>
    tpu.vector_store %arg7[%c0_48, %c4, %c0_49], %158 {strides = array<i32>} : memref<2x8x32xf32, #tpu.memory_space<vmem>>, vector<2x1x32xf32>,
    %159 = arith.truncf %155 : vector<2x32xf32> to vector<2x32xbf16>
    %cst_50 = arith.constant dense<0.000000e+00> : vector<2x128xf32>
    %160 = tpu.matmul %159, %26, %cst_50 {dimension_numbers = #tpu.dot_dimension_numbers<[1], [0], [0], [1], [0, 0, 1, 1], [], []>} : vector<2x32xbf16>, vector<32x128xbf16>, vector<2x128xf32> -> vector<2x128xf32>
    %161 = vector.extract_strided_slice %25 {offsets = [0, 5, 0], sizes = [2, 1, 128], strides = [1, 1, 1]} : vector<2x8x128xf32> to vector<2x1x128xf32>
    %162 = vector.shape_cast %161 : vector<2x1x128xf32> to vector<2x128xf32>
    %163 = arith.addf %160, %162 : vector<2x128xf32>
    %164 = arith.negf %163 : vector<2x128xf32>
    %165 = math.exp %164 : vector<2x128xf32>
    %cst_51 = arith.constant 1.000000e+00 : f32
    %166 = vector.broadcast %cst_51 : f32 to vector<2x128xf32>
    %167 = arith.addf %166, %165 : vector<2x128xf32>
    %168 = arith.divf %166, %167 : vector<2x128xf32>
    %169 = vector.extract_strided_slice %168 {offsets = [0, 0], sizes = [2, 32], strides = [1, 1]} : vector<2x128xf32> to vector<2x32xf32>
    %170 = vector.extract_strided_slice %168 {offsets = [0, 32], sizes = [2, 32], strides = [1, 1]} : vector<2x128xf32> to vector<2x32xf32>
    %171 = vector.extract_strided_slice %168 {offsets = [0, 64], sizes = [2, 32], strides = [1, 1]} : vector<2x128xf32> to vector<2x32xf32>
    %cst_52 = arith.constant 2.000000e+00 : f32
    %172 = vector.broadcast %cst_52 : f32 to vector<2x32xf32>
    %173 = arith.mulf %172, %171 : vector<2x32xf32>
    %cst_53 = arith.constant 1.000000e+00 : f32
    %174 = vector.broadcast %cst_53 : f32 to vector<2x32xf32>
    %175 = arith.subf %173, %174 : vector<2x32xf32>
    %176 = vector.extract_strided_slice %168 {offsets = [0, 96], sizes = [2, 32], strides = [1, 1]} : vector<2x128xf32> to vector<2x32xf32>
    %177 = arith.mulf %170, %153 : vector<2x32xf32>
    %178 = arith.mulf %169, %175 : vector<2x32xf32>
    %179 = arith.addf %177, %178 : vector<2x32xf32>
    %180 = math.tanh %179 : vector<2x32xf32>
    %181 = arith.mulf %176, %180 : vector<2x32xf32>
    %c0_54 = arith.constant 0 : index
    %c5 = arith.constant 5 : index
    %c0_55 = arith.constant 0 : index
    %182 = vector.load %arg7[%c0_54, %c5, %c0_55] : memref<2x8x32xf32, #tpu.memory_space<vmem>>, vector<2x1x32xf32>
    %183 = vector.shape_cast %182 : vector<2x1x32xf32> to vector<2x32xf32>
    %184 = vector.shape_cast %181 : vector<2x32xf32> to vector<2x1x32xf32>
    tpu.vector_store %arg7[%c0_54, %c5, %c0_55], %184 {strides = array<i32>} : memref<2x8x32xf32, #tpu.memory_space<vmem>>, vector<2x1x32xf32>,
    %185 = arith.truncf %181 : vector<2x32xf32> to vector<2x32xbf16>
    %cst_56 = arith.constant dense<0.000000e+00> : vector<2x128xf32>
    %186 = tpu.matmul %185, %26, %cst_56 {dimension_numbers = #tpu.dot_dimension_numbers<[1], [0], [0], [1], [0, 0, 1, 1], [], []>} : vector<2x32xbf16>, vector<32x128xbf16>, vector<2x128xf32> -> vector<2x128xf32>
    %187 = vector.extract_strided_slice %25 {offsets = [0, 6, 0], sizes = [2, 1, 128], strides = [1, 1, 1]} : vector<2x8x128xf32> to vector<2x1x128xf32>
    %188 = vector.shape_cast %187 : vector<2x1x128xf32> to vector<2x128xf32>
    %189 = arith.addf %186, %188 : vector<2x128xf32>
    %190 = arith.negf %189 : vector<2x128xf32>
    %191 = math.exp %190 : vector<2x128xf32>
    %cst_57 = arith.constant 1.000000e+00 : f32
    %192 = vector.broadcast %cst_57 : f32 to vector<2x128xf32>
    %193 = arith.addf %192, %191 : vector<2x128xf32>
    %194 = arith.divf %192, %193 : vector<2x128xf32>
    %195 = vector.extract_strided_slice %194 {offsets = [0, 0], sizes = [2, 32], strides = [1, 1]} : vector<2x128xf32> to vector<2x32xf32>
    %196 = vector.extract_strided_slice %194 {offsets = [0, 32], sizes = [2, 32], strides = [1, 1]} : vector<2x128xf32> to vector<2x32xf32>
    %197 = vector.extract_strided_slice %194 {offsets = [0, 64], sizes = [2, 32], strides = [1, 1]} : vector<2x128xf32> to vector<2x32xf32>
    %cst_58 = arith.constant 2.000000e+00 : f32
    %198 = vector.broadcast %cst_58 : f32 to vector<2x32xf32>
    %199 = arith.mulf %198, %197 : vector<2x32xf32>
    %cst_59 = arith.constant 1.000000e+00 : f32
    %200 = vector.broadcast %cst_59 : f32 to vector<2x32xf32>
    %201 = arith.subf %199, %200 : vector<2x32xf32>
    %202 = vector.extract_strided_slice %194 {offsets = [0, 96], sizes = [2, 32], strides = [1, 1]} : vector<2x128xf32> to vector<2x32xf32>
    %203 = arith.mulf %196, %179 : vector<2x32xf32>
    %204 = arith.mulf %195, %201 : vector<2x32xf32>
    %205 = arith.addf %203, %204 : vector<2x32xf32>
    %206 = math.tanh %205 : vector<2x32xf32>
    %207 = arith.mulf %202, %206 : vector<2x32xf32>
    %c0_60 = arith.constant 0 : index
    %c6 = arith.constant 6 : index
    %c0_61 = arith.constant 0 : index
    %208 = vector.load %arg7[%c0_60, %c6, %c0_61] : memref<2x8x32xf32, #tpu.memory_space<vmem>>, vector<2x1x32xf32>
    %209 = vector.shape_cast %208 : vector<2x1x32xf32> to vector<2x32xf32>
    %210 = vector.shape_cast %207 : vector<2x32xf32> to vector<2x1x32xf32>
    tpu.vector_store %arg7[%c0_60, %c6, %c0_61], %210 {strides = array<i32>} : memref<2x8x32xf32, #tpu.memory_space<vmem>>, vector<2x1x32xf32>,
    %211 = arith.truncf %207 : vector<2x32xf32> to vector<2x32xbf16>
    %cst_62 = arith.constant dense<0.000000e+00> : vector<2x128xf32>
    %212 = tpu.matmul %211, %26, %cst_62 {dimension_numbers = #tpu.dot_dimension_numbers<[1], [0], [0], [1], [0, 0, 1, 1], [], []>} : vector<2x32xbf16>, vector<32x128xbf16>, vector<2x128xf32> -> vector<2x128xf32>
    %213 = vector.extract_strided_slice %25 {offsets = [0, 7, 0], sizes = [2, 1, 128], strides = [1, 1, 1]} : vector<2x8x128xf32> to vector<2x1x128xf32>
    %214 = vector.shape_cast %213 : vector<2x1x128xf32> to vector<2x128xf32>
    %215 = arith.addf %212, %214 : vector<2x128xf32>
    %216 = arith.negf %215 : vector<2x128xf32>
    %217 = math.exp %216 : vector<2x128xf32>
    %cst_63 = arith.constant 1.000000e+00 : f32
    %218 = vector.broadcast %cst_63 : f32 to vector<2x128xf32>
    %219 = arith.addf %218, %217 : vector<2x128xf32>
    %220 = arith.divf %218, %219 : vector<2x128xf32>
    %221 = vector.extract_strided_slice %220 {offsets = [0, 0], sizes = [2, 32], strides = [1, 1]} : vector<2x128xf32> to vector<2x32xf32>
    %222 = vector.extract_strided_slice %220 {offsets = [0, 32], sizes = [2, 32], strides = [1, 1]} : vector<2x128xf32> to vector<2x32xf32>
    %223 = vector.extract_strided_slice %220 {offsets = [0, 64], sizes = [2, 32], strides = [1, 1]} : vector<2x128xf32> to vector<2x32xf32>
    %cst_64 = arith.constant 2.000000e+00 : f32
    %224 = vector.broadcast %cst_64 : f32 to vector<2x32xf32>
    %225 = arith.mulf %224, %223 : vector<2x32xf32>
    %cst_65 = arith.constant 1.000000e+00 : f32
    %226 = vector.broadcast %cst_65 : f32 to vector<2x32xf32>
    %227 = arith.subf %225, %226 : vector<2x32xf32>
    %228 = vector.extract_strided_slice %220 {offsets = [0, 96], sizes = [2, 32], strides = [1, 1]} : vector<2x128xf32> to vector<2x32xf32>
    %229 = arith.mulf %222, %205 : vector<2x32xf32>
    %230 = arith.mulf %221, %227 : vector<2x32xf32>
    %231 = arith.addf %229, %230 : vector<2x32xf32>
    %232 = math.tanh %231 : vector<2x32xf32>
    %233 = arith.mulf %228, %232 : vector<2x32xf32>
    %c0_66 = arith.constant 0 : index
    %c7 = arith.constant 7 : index
    %c0_67 = arith.constant 0 : index
    %234 = vector.load %arg7[%c0_66, %c7, %c0_67] : memref<2x8x32xf32, #tpu.memory_space<vmem>>, vector<2x1x32xf32>
    %235 = vector.shape_cast %234 : vector<2x1x32xf32> to vector<2x32xf32>
    %236 = vector.shape_cast %233 : vector<2x32xf32> to vector<2x1x32xf32>
    tpu.vector_store %arg7[%c0_66, %c7, %c0_67], %236 {strides = array<i32>} : memref<2x8x32xf32, #tpu.memory_space<vmem>>, vector<2x1x32xf32>,
    return
  }
  func.func @transform_0(%arg0: i32) -> (i32, i32, i32) {
    %c0_i32 = arith.constant 0 : i32
    %c0_i32_0 = arith.constant 0 : i32
    %c0_i32_1 = arith.constant 0 : i32
    return %arg0, %c0_i32, %c0_i32_0 : i32, i32, i32
  }
  func.func @transform_1(%arg0: i32) -> (i32, i32, i32) {
    %c0_i32 = arith.constant 0 : i32
    %c0_i32_0 = arith.constant 0 : i32
    %c0_i32_1 = arith.constant 0 : i32
    %c0_i32_2 = arith.constant 0 : i32
    return %c0_i32, %c0_i32_0, %c0_i32_1 : i32, i32, i32
  }
  func.func @transform_2(%arg0: i32) -> (i32, i32) {
    %c0_i32 = arith.constant 0 : i32
    %c0_i32_0 = arith.constant 0 : i32
    %c0_i32_1 = arith.constant 0 : i32
    return %c0_i32, %c0_i32_0 : i32, i32
  }
  func.func @transform_3(%arg0: i32) -> (i32, i32) {
    %c0_i32 = arith.constant 0 : i32
    %c0_i32_0 = arith.constant 0 : i32
    %c0_i32_1 = arith.constant 0 : i32
    return %c0_i32, %c0_i32_0 : i32, i32
  }
  func.func @transform_4(%arg0: i32) -> (i32, i32) {
    %c0_i32 = arith.constant 0 : i32
    %c0_i32_0 = arith.constant 0 : i32
    %c0_i32_1 = arith.constant 0 : i32
    return %c0_i32, %c0_i32_0 : i32, i32
  }
  func.func @transform_5(%arg0: i32) -> (i32, i32, i32) {
    %c0_i32 = arith.constant 0 : i32
    %c0_i32_0 = arith.constant 0 : i32
    %c0_i32_1 = arith.constant 0 : i32
    return %arg0, %c0_i32, %c0_i32_0 : i32, i32, i32
  }
  func.func @transform_6(%arg0: i32) -> (i32, i32, i32) {
    %c0_i32 = arith.constant 0 : i32
    %c0_i32_0 = arith.constant 0 : i32
    %c0_i32_1 = arith.constant 0 : i32
    return %arg0, %c0_i32, %c0_i32_0 : i32, i32, i32
  }
}

</mosaic_0001>

<bundles_post_ra>
// kernel: encoder_forward.1
= control target key start
LH: loop header
LB: loop body
LE: loop exit
PB: predicated region body
PF: predicated region fallthrough
CT: control target
= control target key end

     0   :  { %vm29_vm0 = vcmask 31744   ;;  %s1642_s0 = inlined_call_operand.vmem [shape: f32[2,8,4], index: 0, kind: input, shape index: {}]   ;;  %s1643_s1 = inlined_call_operand.vmem [shape: f32[1,8,4], index: 1, kind: input, shape index: {}]   ;;  %s1644_s2 = inlined_call_operand.vmem [shape: bf16[4,128], index: 2, kind: input, shape index: {}]   ;;  %s1645_s3 = inlined_call_operand.vmem [shape: bf16[32,128], index: 3, kind: input, shape index: {}]   ;;  %s1646_s4 = inlined_call_operand.vmem [shape: f32[1,128], index: 4, kind: input, shape index: {}]   ;;  %s1647_s5 = inlined_call_operand.vmem [shape: f32[2,8,4], index: 5, kind: output, shape index: {0}]   ;;  %s1648_s6 = inlined_call_operand.hbm [shape: f32[2,8,32], index: 6, kind: output, shape index: {1}]  }
   0x1   :  { %v1361_v0 = vld [vmem:[%s1642_s0] sm:$0xff]  ;;  %v1366_v1 = vld [vmem:[%s1642_s0 + $0x8] sm:$0xff] }
   0x2   :  { %v26_v2 = vld [vmem:[%s1643_s1] sm:$0xff] }
   0x3   :  { %v27_v3 = vmul.f32 %v26_v2, %v1361_v0  ;;  %v28_v4 = vmul.f32 %v26_v2, %v1366_v1 }
   0x4   :  { %12 = vsyncpa [#allocation3], 0  ;;  %vm46_vm1 = vcmask 1041409   ;;  %vm49_vm2 = vcmask 25600   ;;  %v1382_v32 = vld [vmem:[%s1645_s3 + $0x8] sm:$0xff]   ;;  %vm103_vm3 = vcmask 1041408   ;;  %v79_v40 = vlaneseq }
   0x5   :  { %v30_v5 = vsel %vm29_vm0, %v27_v3, 0.0  ;;  %v37_v6 = vsel %vm29_vm0, %v28_v4, 0.0  ;;  %v92_v33 = vld [vmem:[%s1644_s2] sm:$0x3]  ;;  %v1314_v34 = vmov 0.0   ;;  %vm1315_vm4 = vmmov 0  }
   0x6   :  { %v31_v7 = vrot.slane %v30_v5, 4  ;;  %v38_v8 = vrot.slane %v37_v6, 4  ;;  %1161 = vmatprep.subr.bf16.mxu1 %v1314_v34  ;;  %1155 = vmatprep.subr.bf16.mxu0 %v1314_v34  ;;  %v105_v35 = vsel %vm103_vm3, %v92_v33, 0  ;;  %v1399_v36 = vld [vmem:[%s1645_s3] sm:$0xff]   ;;  %v1316_v37 = vmov 0   ;;  %s1318_s10 = smov 32  }
   0x7   :  { %1162 = vmatpush3.bf16.msra.mxu1 %v1382_v32  ;;  %1156 = vmatpush3.bf16.msra.mxu0 %v105_v35  ;;  %v1409_v41 = vshrl.u32 %v79_v40, 7  ;;  %v1102_v56 = vld [vmem:[%s1646_s4] ss:$0 sm:$0xff]  ;;  %s1317_s4 = smov 64   ;;  %vm169_vm5 = vcmask 261120   ;;  %vm275_vm6 = vcmask 253952  }
   0x8   :  { %v32_v9 = vadd.f32 %v31_v7, %v30_v5  ;;  %v39_v10 = vadd.f32 %v38_v8, %v37_v6  ;;  %1157 = vmatprep.mubr.msk.bf16.mxu0 %vm1315_vm4, %v1314_v34  ;;  %1163 = vmatprep.subr.bf16.mxu1 %v1314_v34  ;;  %s1320_s11 = smov [#allocation2]  }
   0x9   :  { %1165 = vmatprep.mubr.msk.bf16.mxu1 %vm1315_vm4, %v1314_v34  ;;  %1169 = vmatprep.subr.bf16.mxu0 %v1314_v34  ;;  %v1412_v42 = vsub.s32 0, %v1409_v41  ;;  %s1089_s12 = sshll.u32 %s1320_s11, 4  ;;  %s1090_s12 = int_to_ptr.vmem [resolvable:$true] %s1089_s12 }
   0xa   :  { %v33_v11 = vrot.slane %v32_v9, 2  ;;  %v40_v12 = vrot.slane %v39_v10, 2  ;;  %s1292_s13 = scalar_lea.vmem %s1090_s12, 256  ;;  %p1297_p1 = scmp.lt.s32.totalorder %s1090_s12, %s1090_s12 }
   0xb   :  { %1164 = vmatpush3.bf16.msra.mxu1 %v1399_v36  ;;  %p1293_p0 = scmp.ne.s32.totalorder %s1090_s12, %s1292_s13  ;;  %p1298_p2 = scmp.lt.s32.totalorder %s1292_s13, %s1292_s13 }
   0xc   :  { %v34_v13 = vadd.f32 %v33_v11, %v32_v9  ;;  %v41_v14 = vadd.f32 %v40_v12, %v39_v10  ;;  %1177 = vmatprep.subr.bf16.mxu1 %v1314_v34 }
   0xd   :  { %p1299_p3 = por %p1298_p2, %p1297_p1 }
   0xe   :  { %v35_v15 = vrot.slane %v34_v13, 1  ;;  %v42_v16 = vrot.slane %v41_v14, 1  ;;  %1166 = vmatmul.mubr.bf16.vlgmr.msra.gmra.mxu1 %v1316_v37 }
   0xf   :  { %1178 = vmatpush3.bf16.msra.mxu1 %v1382_v32  ;;  %1181 = vmatprep.mubr.msk.bf16.mxu1 %vm1315_vm4, %v1314_v34  ;;  %p1300_p4 = pnand %p1299_p3, %p1293_p0 }
  0x10   :  { %v36_v17 = vadd.f32 %v35_v15, %v34_v13  ;;  %v43_v18 = vadd.f32 %v42_v16, %v41_v14  ;;  %1179 = vmatprep.subr.bf16.mxu1 %v1314_v34 }
  0x12   :  { %v47_v19 = vsel %vm46_vm1, %v43_v18, %v36_v17 }
  0x13   :  { %v50_v20 = vsel %vm49_vm2, %v47_v19, -inf  ;;  %1180 = vmatpush3.bf16.msra.mxu1 %v1399_v36 }
  0x14   :  { %51 = vmax.xlane.f32.xlu0 %v50_v20  ;;  %1193 = vmatprep.subr.bf16.mxu1 %v1314_v34 }
  0x9d   :  { %v52_v21 = vpop.xlane.xlu0 %51 }
  0x9e   :  { %v54_v22 = vrot.slane %v52_v21, 1  ;;  %v57_v23 = vsub.f32 %v36_v17, %v52_v21 }
  0xa0   :  { %v58_v24 = vsub.f32 %v43_v18, %v54_v22  ;;  %v59_v25 = vmul.f32 1.442695, %v57_v23 }
  0xa2   :  { %v61_v26 = vmul.f32 1.442695, %v58_v24 }
  0xa4   :  { %1236 = vpow2.f32 %v61_v26 }
  0xa5   :  { %1238 = vpow2.f32 %v59_v25 }
  0xb1   :  { %v1237_v27 = vpop.eup %1236 }
  0xb2   :  { %v65_v28 = vrot.slane %v1237_v27, 7  ;;  %v1239_v29 = vpop.eup %1238 }
  0xb4   :  { %v66_v30 = vsel %vm46_vm1, %v65_v28, %v1239_v29 }
  0xb5   :  { %v68_v31 = vsel %vm49_vm2, %v66_v30, 0.0 }
  0xb6   :  { %69 = vadd.xlane.f32.xlu0 %v68_v31 }
  0xce   :  { %v207_v52 = vpop.f32.mrf.mxu1 }
  0xd0   :  { %v1167_v53 = vpop.f32.mrf.mxu1 }
  0xd2   :  { %v210_v54 = vpop.f32.mrf.mxu1 }
  0xd4   :  { %v1168_v55 = vpop.f32.mrf.mxu1 }
 0x13f   :  { %v70_v38 = vpop.xlane.xlu0 %69 }
 0x140   :  { %v72_v39 = vrot.slane %v70_v38, 1  ;;  %1240 = vrcp.f32 %v70_v38 }
 0x142   :  { %1242 = vrcp.f32 %v72_v39 }
 0x14d   :  { %v1241_v43 = vpop.eup %1240 }
 0x14e   :  { %v76_v44 = vmul.f32 %v1241_v43, %v1239_v29 }
 0x14f   :  { %v1243_v45 = vpop.eup %1242 }
 0x150   :  { %v78_v46 = vmul.f32 %v1243_v45, %v1237_v27  ;;  %v82_v47 = vrot.slane %v76_v44, %v1412_v42 }
 0x152   :  { %v86_v48 = vrot.slane %v78_v46, %v1412_v42  ;;  %v87_v49 = vmul.f32 %v82_v47, %v1361_v0 }
 0x154   :  { %v88_v50 = vmul.f32 %v86_v48, %v1366_v1  ;;  %89 = vst.msk [vmem:[%s1647_s5] sm:$0xff] %vm29_vm0, %v87_v49 }
 0x156   :  { %90 = vst.msk [vmem:[%s1647_s5 + $0x8] sm:$0xff] %vm29_vm0, %v88_v50  ;;  %v91_v51 = vpack.c.bf16 %v88_v50, %v87_v49 }
 0x158   :  { %1158 = vmatmul.mubr.msk.bf16.vlgmr.msra.gmra.mxu0 %vm29_vm0, %v91_v51 }
 0x159   :  { %1170 = vmatpush3.bf16.msra.mxu0 %v1382_v32  ;;  %1173 = vmatprep.mubr.msk.bf16.mxu0 %vm1315_vm4, %v1314_v34 }
 0x15a   :  { %1171 = vmatprep.subr.bf16.mxu0 %v1314_v34 }
 0x15d   :  { %1172 = vmatpush3.bf16.msra.mxu0 %v1399_v36 }
 0x15e   :  { %1185 = vmatprep.subr.bf16.mxu0 %v1314_v34 }
 0x218   :  { %v141_v57 = vpop.f32.mrf.mxu0 }
 0x219   :  { %v142_v58 = vadd.f32 %v1102_v56, %v141_v57 }
 0x21a   :  { %v1159_v59 = vpop.f32.mrf.mxu0 }
 0x21b   :  { %v282_v62 = vrot.slane %v142_v58, 1  ;;  %v396_v63 = vrot.slane %v142_v58, 2  ;;  %v511_v1 = vrot.slane %v142_v58, 3  ;;  %v626_v2 = vrot.slane %v142_v58, 4 }
 0x21c   :  { %v144_v60 = vpop.f32.mrf.mxu0  ;;  %v741_v3 = vrot.slane %v142_v58, 5  ;;  %v856_v4 = vrot.slane %v142_v58, 6  ;;  %v971_v16 = vrot.slane %v142_v58, 7 }
 0x21d   :  { %v145_v61 = vadd.f32 %v1102_v56, %v144_v60 }
 0x21e   :  { %v1160_v0 = vpop.f32.mrf.mxu0 }
 0x21f   :  { %v166_v5 = vrot.slane %v145_v61, 7  ;;  %v283_v6 = vsel %vm46_vm1, %v145_v61, %v282_v62  ;;  %v397_v7 = vrot.slane %v145_v61, 1  ;;  %v512_v8 = vrot.slane %v145_v61, 2 }
 0x220   :  { %v627_v9 = vrot.slane %v145_v61, 3  ;;  %v742_v10 = vrot.slane %v145_v61, 4  ;;  %v857_v11 = vrot.slane %v145_v61, 5  ;;  %v972_v12 = vrot.slane %v145_v61, 6 }
 0x221   :  { %v167_v13 = vsel %vm46_vm1, %v166_v5, %v142_v58  ;;  %v1439_v14 = vsel %vm46_vm1, %v397_v7, %v396_v63  ;;  %v1442_v15 = vsel %vm46_vm1, %v512_v8, %v511_v1 }
 0x222   :  { %v208_v17 = vadd.f32 %v207_v52, %v167_v13  ;;  %v1445_v18 = vsel %vm46_vm1, %v627_v9, %v626_v2  ;;  %v1448_v19 = vsel %vm46_vm1, %v742_v10, %v741_v3  ;;  %v1451_v20 = vsel %vm46_vm1, %v857_v11, %v856_v4 }
 0x223   :  { %v1454_v21 = vsel %vm46_vm1, %v972_v12, %v971_v16 }
 0x224   :  { %v1106_v22 = vmul.f32 -1.442695, %v208_v17 }
 0x226   :  { %1244 = vpow2.f32 %v1106_v22 }
 0x233   :  { %v1245_v23 = vpop.eup %1244 }
 0x234   :  { %v216_v24 = vadd.f32 1.0, %v1245_v23 }
 0x236   :  { %1246 = vrcp.f32 %v216_v24 }
 0x243   :  { %v1247_v25 = vpop.eup %1246 }
 0x244   :  { %v219_v26 = vmul.f32 2.0, %v1247_v25  ;;  %v221_v30 = vmul.f32 0.0, %v1247_v25 }
 0x246   :  { %v1107_v27 = vadd.f32 -1.0, %v219_v26 }
 0x248   :  { %223 = vrot.lane.b32.xlu1 %v1107_v27, %s1317_s4 }
 0x2ba   :  { %v224_v28 = vpop.permute.xlu1 %223 }
 0x2bb   :  { %v226_v29 = vmul.f32 %v1247_v25, %v224_v28 }
 0x2bd   :  { %228 = vrot.lane.b32.xlu1 %v226_v29, %s1318_s10 }
 0x32f   :  { %v229_v31 = vpop.permute.xlu1 %228 }
 0x330   :  { %v231_v33 = vadd.f32 %v229_v31, %v221_v30 }
 0x332   :  { %1248 = vtanh.f32 %v231_v33 }
 0x33f   :  { %v1249_v35 = vpop.eup %1248 }
 0x340   :  { %234 = vrot.lane.b32.xlu0 %v1249_v35, %s1317_s4 }
 0x3b2   :  { %v235_v37 = vpop.permute.xlu0 %234 }
 0x3b3   :  { %v1459_v38 = vmul.f32 %v1247_v25, %v235_v37 }
 0x3b5   :  { %v278_v39 = vpack.c.bf16 %v1459_v38, %v1459_v38 }
 0x3b7   :  { %280 = vrot.lane.b32.xlu1 %v278_v39, %s1318_s10 }
 0x429   :  { %v281_v40 = vpop.permute.xlu1 %280 }
 0x42a   :  { %1174 = vmatmul.mubr.msk.bf16.vlgmr.msra.gmra.mxu0 %vm169_vm5, %v281_v40 }
 0x42b   :  { %1186 = vmatpush3.bf16.msra.mxu0 %v1382_v32  ;;  %1189 = vmatprep.mubr.msk.bf16.mxu0 %vm1315_vm4, %v1314_v34 }
 0x42c   :  { %1187 = vmatprep.subr.bf16.mxu0 %v1314_v34 }
 0x42f   :  { %1188 = vmatpush3.bf16.msra.mxu0 %v1399_v36 }
 0x430   :  { %1201 = vmatprep.subr.bf16.mxu0 %v1314_v34 }
 0x4ea   :  { %v322_v43 = vpop.f32.mrf.mxu0 }
 0x4eb   :  { %v323_v44 = vadd.f32 %v322_v43, %v283_v6 }
 0x4ec   :  { %v1175_v45 = vpop.f32.mrf.mxu0 }
 0x4ed   :  { %v1109_v46 = vmul.f32 -1.442695, %v323_v44 }
 0x4ee   :  { %v325_v47 = vpop.f32.mrf.mxu0 }
 0x4ef   :  { %1250 = vpow2.f32 %v1109_v46 }
 0x4f0   :  { %v1176_v48 = vpop.f32.mrf.mxu0 }
 0x4fc   :  { %v1251_v49 = vpop.eup %1250 }
 0x4fd   :  { %v331_v50 = vadd.f32 1.0, %v1251_v49 }
 0x4ff   :  { %1252 = vrcp.f32 %v331_v50 }
 0x50c   :  { %v1253_v51 = vpop.eup %1252 }
 0x50d   :  { %v334_v52 = vmul.f32 2.0, %v1253_v51  ;;  %v336_v56 = vmul.f32 %v1253_v51, %v231_v33 }
 0x50f   :  { %v1110_v53 = vadd.f32 -1.0, %v334_v52 }
 0x511   :  { %338 = vrot.lane.b32.xlu1 %v1110_v53, %s1317_s4 }
 0x583   :  { %v339_v54 = vpop.permute.xlu1 %338 }
 0x584   :  { %v341_v55 = vmul.f32 %v1253_v51, %v339_v54 }
 0x586   :  { %343 = vrot.lane.b32.xlu1 %v341_v55, %s1318_s10 }
 0x5f8   :  { %v344_v57 = vpop.permute.xlu1 %343 }
 0x5f9   :  { %v346_v58 = vadd.f32 %v344_v57, %v336_v56 }
 0x5fb   :  { %1254 = vtanh.f32 %v346_v58 }
 0x608   :  { %v1255_v59 = vpop.eup %1254 }
 0x609   :  { %349 = vrot.lane.b32.xlu1 %v1255_v59, %s1317_s4 }
 0x67b   :  { %v350_v60 = vpop.permute.xlu1 %349 }
 0x67c   :  { %v1474_v61 = vmul.f32 %v1253_v51, %v350_v60 }
 0x67e   :  { %v392_v62 = vpack.c.bf16 %v1474_v61, %v1474_v61 }
 0x680   :  { %394 = vrot.lane.b32.xlu1 %v392_v62, %s1318_s10 }
 0x6f2   :  { %v395_v63 = vpop.permute.xlu1 %394 }
 0x6f3   :  { %1182 = vmatmul.mubr.msk.bf16.vlgmr.msra.gmra.mxu1 %vm169_vm5, %v395_v63 }
 0x6f4   :  { %1194 = vmatpush3.bf16.msra.mxu1 %v1382_v32  ;;  %1197 = vmatprep.mubr.msk.bf16.mxu1 %vm1315_vm4, %v1314_v34 }
 0x6f5   :  { %1195 = vmatprep.subr.bf16.mxu1 %v1314_v34 }
 0x6f8   :  { %1196 = vmatpush3.bf16.msra.mxu1 %v1399_v36 }
 0x6f9   :  { %1209 = vmatprep.subr.bf16.mxu1 %v1314_v34 }
 0x7b3   :  { %v437_v0 = vpop.f32.mrf.mxu1 }
 0x7b4   :  { %v438_v1 = vadd.f32 %v437_v0, %v1439_v14 }
 0x7b5   :  { %v1183_v2 = vpop.f32.mrf.mxu1 }
 0x7b6   :  { %v1112_v3 = vmul.f32 -1.442695, %v438_v1 }
 0x7b7   :  { %v440_v4 = vpop.f32.mrf.mxu1 }
 0x7b8   :  { %1256 = vpow2.f32 %v1112_v3 }
 0x7b9   :  { %v1184_v5 = vpop.f32.mrf.mxu1 }
 0x7c5   :  { %v1257_v6 = vpop.eup %1256 }
 0x7c6   :  { %v446_v7 = vadd.f32 1.0, %v1257_v6 }
 0x7c8   :  { %1258 = vrcp.f32 %v446_v7 }
 0x7d5   :  { %v1259_v8 = vpop.eup %1258 }
 0x7d6   :  { %v449_v9 = vmul.f32 2.0, %v1259_v8  ;;  %v451_v13 = vmul.f32 %v1259_v8, %v346_v58 }
 0x7d8   :  { %v1113_v10 = vadd.f32 -1.0, %v449_v9 }
 0x7da   :  { %453 = vrot.lane.b32.xlu1 %v1113_v10, %s1317_s4 }
 0x84c   :  { %v454_v11 = vpop.permute.xlu1 %453 }
 0x84d   :  { %v456_v12 = vmul.f32 %v1259_v8, %v454_v11 }
 0x84f   :  { %458 = vrot.lane.b32.xlu0 %v456_v12, %s1318_s10 }
 0x8c1   :  { %v459_v16 = vpop.permute.xlu0 %458 }
 0x8c2   :  { %v461_v14 = vadd.f32 %v459_v16, %v451_v13 }
 0x8c4   :  { %1260 = vtanh.f32 %v461_v14 }
 0x8d1   :  { %v1261_v17 = vpop.eup %1260 }
 0x8d2   :  { %464 = vrot.lane.b32.xlu1 %v1261_v17, %s1317_s4 }
 0x944   :  { %v465_v22 = vpop.permute.xlu1 %464 }
 0x945   :  { %v1490_v23 = vmul.f32 %v1259_v8, %v465_v22 }
 0x947   :  { %v507_v24 = vpack.c.bf16 %v1490_v23, %v1490_v23 }
 0x949   :  { %509 = vrot.lane.b32.xlu0 %v507_v24, %s1318_s10 }
 0x9bb   :  { %v510_v25 = vpop.permute.xlu0 %509 }
 0x9bc   :  { %1190 = vmatmul.mubr.msk.bf16.vlgmr.msra.gmra.mxu0 %vm169_vm5, %v510_v25 }
 0x9bd   :  { %1202 = vmatpush3.bf16.msra.mxu0 %v1382_v32  ;;  %1205 = vmatprep.mubr.msk.bf16.mxu0 %vm1315_vm4, %v1314_v34 }
 0x9be   :  { %1203 = vmatprep.subr.bf16.mxu0 %v1314_v34 }
 0x9c1   :  { %1204 = vmatpush3.bf16.msra.mxu0 %v1399_v36 }
 0x9c2   :  { %1217 = vmatprep.subr.bf16.mxu0 %v1314_v34 }
 0xa7c   :  { %v552_v26 = vpop.f32.mrf.mxu0 }
 0xa7d   :  { %v553_v27 = vadd.f32 %v552_v26, %v1442_v15 }
 0xa7e   :  { %v1191_v28 = vpop.f32.mrf.mxu0 }
 0xa7f   :  { %v1115_v29 = vmul.f32 -1.442695, %v553_v27 }
 0xa80   :  { %v555_v30 = vpop.f32.mrf.mxu0 }
 0xa81   :  { %1262 = vpow2.f32 %v1115_v29 }
 0xa82   :  { %v1192_v31 = vpop.f32.mrf.mxu0 }
 0xa8e   :  { %v1263_v33 = vpop.eup %1262 }
 0xa8f   :  { %v561_v35 = vadd.f32 1.0, %v1263_v33 }
 0xa91   :  { %1264 = vrcp.f32 %v561_v35 }
 0xa9e   :  { %v1265_v37 = vpop.eup %1264 }
 0xa9f   :  { %v564_v39 = vmul.f32 2.0, %v1265_v37  ;;  %v566_v45 = vmul.f32 %v1265_v37, %v461_v14 }
 0xaa1   :  { %v1116_v40 = vadd.f32 -1.0, %v564_v39 }
 0xaa3   :  { %568 = vrot.lane.b32.xlu1 %v1116_v40, %s1317_s4 }
 0xb15   :  { %v569_v43 = vpop.permute.xlu1 %568 }
 0xb16   :  { %v571_v44 = vmul.f32 %v1265_v37, %v569_v43 }
 0xb18   :  { %573 = vrot.lane.b32.xlu0 %v571_v44, %s1318_s10 }
 0xb8a   :  { %v574_v46 = vpop.permute.xlu0 %573 }
 0xb8b   :  { %v576_v15 = vadd.f32 %v574_v46, %v566_v45 }
 0xb8d   :  { %1266 = vtanh.f32 %v576_v15 }
 0xb9a   :  { %v1267_v47 = vpop.eup %1266 }
 0xb9b   :  { %579 = vrot.lane.b32.xlu1 %v1267_v47, %s1317_s4 }
 0xc0d   :  { %v580_v48 = vpop.permute.xlu1 %579 }
 0xc0e   :  { %v1506_v49 = vmul.f32 %v1265_v37, %v580_v48 }
 0xc10   :  { %v622_v50 = vpack.c.bf16 %v1506_v49, %v1506_v49 }
 0xc12   :  { %624 = vrot.lane.b32.xlu0 %v622_v50, %s1318_s10 }
 0xc84   :  { %v625_v51 = vpop.permute.xlu0 %624 }
 0xc85   :  { %1198 = vmatmul.mubr.msk.bf16.vlgmr.msra.gmra.mxu1 %vm169_vm5, %v625_v51 }
 0xc86   :  { %1210 = vmatpush3.bf16.msra.mxu1 %v1382_v32  ;;  %1213 = vmatprep.mubr.msk.bf16.mxu1 %vm1315_vm4, %v1314_v34 }
 0xc87   :  { %1211 = vmatprep.subr.bf16.mxu1 %v1314_v34 }
 0xc8a   :  { %1212 = vmatpush3.bf16.msra.mxu1 %v1399_v36 }
 0xd45   :  { %v667_v52 = vpop.f32.mrf.mxu1 }
 0xd46   :  { %v668_v53 = vadd.f32 %v667_v52, %v1445_v18 }
 0xd47   :  { %v1199_v54 = vpop.f32.mrf.mxu1 }
 0xd48   :  { %v1118_v55 = vmul.f32 -1.442695, %v668_v53 }
 0xd49   :  { %v670_v56 = vpop.f32.mrf.mxu1 }
 0xd4a   :  { %1268 = vpow2.f32 %v1118_v55 }
 0xd4b   :  { %v1200_v57 = vpop.f32.mrf.mxu1 }
 0xd57   :  { %v1269_v58 = vpop.eup %1268 }
 0xd58   :  { %v676_v59 = vadd.f32 1.0, %v1269_v58 }
 0xd5a   :  { %1270 = vrcp.f32 %v676_v59 }
 0xd67   :  { %v1271_v60 = vpop.eup %1270 }
 0xd68   :  { %v679_v62 = vmul.f32 2.0, %v1271_v60  ;;  %v681_v2 = vmul.f32 %v1271_v60, %v576_v15 }
 0xd6a   :  { %v1119_v63 = vadd.f32 -1.0, %v679_v62 }
 0xd6c   :  { %683 = vrot.lane.b32.xlu1 %v1119_v63, %s1317_s4 }
 0xdde   :  { %v684_v0 = vpop.permute.xlu1 %683 }
 0xddf   :  { %v686_v1 = vmul.f32 %v1271_v60, %v684_v0 }
 0xde1   :  { %688 = vrot.lane.b32.xlu0 %v686_v1, %s1318_s10 }
 0xe53   :  { %v689_v3 = vpop.permute.xlu0 %688 }
 0xe54   :  { %v691_v18 = vadd.f32 %v689_v3, %v681_v2 }
 0xe56   :  { %1272 = vtanh.f32 %v691_v18 }
 0xe63   :  { %v1273_v4 = vpop.eup %1272 }
 0xe64   :  { %694 = vrot.lane.b32.xlu1 %v1273_v4, %s1317_s4 }
 0xed6   :  { %v695_v5 = vpop.permute.xlu1 %694 }
 0xed7   :  { %v1521_v6 = vmul.f32 %v1271_v60, %v695_v5  ;;  %v1319_v5 = vmov 1966171168  }
 0xed9   :  { %v737_v7 = vpack.c.bf16 %v1521_v6, %v1521_v6 }
 0xedb   :  { %739 = vrot.lane.b32.xlu0 %v737_v7, %s1318_s10  ;;  %v240_v7 = vunpack.c.l.s4 %v1319_v5 }
 0xf4d   :  { %v740_v8 = vpop.permute.xlu0 %739 }
 0xf4e   :  { %1206 = vmatmul.mubr.msk.bf16.vlgmr.msra.gmra.mxu0 %vm169_vm5, %v740_v8  ;;  %v241_v8 = vunpack.c.0.s8 %v240_v7 }
 0xf4f   :  { %1218 = vmatpush3.bf16.msra.mxu0 %v1382_v32  ;;  %1221 = vmatprep.mubr.msk.bf16.mxu0 %vm1315_vm4, %v1314_v34 }
 0xf50   :  { %1219 = vmatprep.subr.bf16.mxu0 %v1314_v34 }
 0xf53   :  { %1220 = vmatpush3.bf16.msra.mxu0 %v1399_v36 }
0x100e   :  { %v782_v9 = vpop.f32.mrf.mxu0 }
0x100f   :  { %v783_v10 = vadd.f32 %v782_v9, %v1448_v19 }
0x1010   :  { %v1207_v11 = vpop.f32.mrf.mxu0 }
0x1011   :  { %v1121_v12 = vmul.f32 -1.442695, %v783_v10 }
0x1012   :  { %v785_v13 = vpop.f32.mrf.mxu0 }
0x1013   :  { %1274 = vpow2.f32 %v1121_v12 }
0x1014   :  { %v1208_v16 = vpop.f32.mrf.mxu0 }
0x1020   :  { %v1275_v14 = vpop.eup %1274 }
0x1021   :  { %v791_v17 = vadd.f32 1.0, %v1275_v14 }
0x1023   :  { %1276 = vrcp.f32 %v791_v17 }
0x1030   :  { %v1277_v22 = vpop.eup %1276 }
0x1031   :  { %v794_v32 = vmul.f32 2.0, %v1277_v22  ;;  %v796_v36 = vmul.f32 %v1277_v22, %v691_v18 }
0x1033   :  { %v1122_v24 = vadd.f32 -1.0, %v794_v32 }
0x1035   :  { %798 = vrot.lane.b32.xlu1 %v1122_v24, %s1317_s4 }
0x10a7   :  { %v799_v25 = vpop.permute.xlu1 %798 }
0x10a8   :  { %v801_v34 = vmul.f32 %v1277_v22, %v799_v25 }
0x10aa   :  { %803 = vrot.lane.b32.xlu0 %v801_v34, %s1318_s10 }
0x111c   :  { %v804_v26 = vpop.permute.xlu0 %803 }
0x111d   :  { %v806_v19 = vadd.f32 %v804_v26, %v796_v36 }
0x111f   :  { %1278 = vtanh.f32 %v806_v19 }
0x112c   :  { %v1279_v27 = vpop.eup %1278 }
0x112d   :  { %809 = vrot.lane.b32.xlu1 %v1279_v27, %s1317_s4 }
0x119f   :  { %v810_v28 = vpop.permute.xlu1 %809 }
0x11a0   :  { %v1536_v29 = vmul.f32 %v1277_v22, %v810_v28 }
0x11a2   :  { %v852_v30 = vpack.c.bf16 %v1536_v29, %v1536_v29 }
0x11a4   :  { %854 = vrot.lane.b32.xlu0 %v852_v30, %s1318_s10 }
0x1216   :  { %v855_v31 = vpop.permute.xlu0 %854 }
0x1217   :  { %1214 = vmatmul.mubr.msk.bf16.vlgmr.msra.gmra.mxu1 %vm169_vm5, %v855_v31 }
0x12d7   :  { %v897_v33 = vpop.f32.mrf.mxu1 }
0x12d8   :  { %v898_v35 = vadd.f32 %v897_v33, %v1451_v20 }
0x12d9   :  { %v1215_v37 = vpop.f32.mrf.mxu1 }
0x12da   :  { %v1124_v39 = vmul.f32 -1.442695, %v898_v35 }
0x12db   :  { %v900_v40 = vpop.f32.mrf.mxu1 }
0x12dc   :  { %1280 = vpow2.f32 %v1124_v39 }
0x12dd   :  { %v1216_v43 = vpop.f32.mrf.mxu1 }
0x12e9   :  { %v1281_v44 = vpop.eup %1280 }
0x12ea   :  { %v906_v45 = vadd.f32 1.0, %v1281_v44 }
0x12ec   :  { %1282 = vrcp.f32 %v906_v45 }
0x12f9   :  { %v1283_v46 = vpop.eup %1282 }
0x12fa   :  { %v909_v15 = vmul.f32 2.0, %v1283_v46  ;;  %v911_v51 = vmul.f32 %v1283_v46, %v806_v19 }
0x12fc   :  { %v1125_v47 = vadd.f32 -1.0, %v909_v15 }
0x12fe   :  { %913 = vrot.lane.b32.xlu1 %v1125_v47, %s1317_s4 }
0x1370   :  { %v914_v48 = vpop.permute.xlu1 %913 }
0x1371   :  { %v916_v50 = vmul.f32 %v1283_v46, %v914_v48 }
0x1373   :  { %918 = vrot.lane.b32.xlu0 %v916_v50, %s1318_s10 }
0x13e5   :  { %v919_v52 = vpop.permute.xlu0 %918 }
0x13e6   :  { %v921_v20 = vadd.f32 %v919_v52, %v911_v51 }
0x13e8   :  { %1284 = vtanh.f32 %v921_v20 }
0x13f5   :  { %v1285_v53 = vpop.eup %1284 }
0x13f6   :  { %924 = vrot.lane.b32.xlu1 %v1285_v53, %s1317_s4 }
0x1468   :  { %v925_v54 = vpop.permute.xlu1 %924 }
0x1469   :  { %v927_v55 = vmul.f32 %v1283_v46, %v925_v54 }
0x146b   :  { %v967_v56 = vpack.c.bf16 %v927_v55, %v927_v55 }
0x146d   :  { %969 = vrot.lane.b32.xlu0 %v967_v56, %s1318_s10 }
0x14df   :  { %v970_v57 = vpop.permute.xlu0 %969 }
0x14e0   :  { %1222 = vmatmul.mubr.msk.bf16.vlgmr.msra.gmra.mxu0 %vm169_vm5, %v970_v57 }
0x15a0   :  { %v1012_v58 = vpop.f32.mrf.mxu0 }
0x15a1   :  { %v1013_v59 = vadd.f32 %v1012_v58, %v1454_v21  ;;  %v1554_v21 = vsub.s32 %v241_v8, %v1409_v41 }
0x15a2   :  { %v1223_v60 = vpop.f32.mrf.mxu0 }
0x15a3   :  { %v1127_v62 = vmul.f32 -1.442695, %v1013_v59  ;;  %v245_v9 = vrot.slane %v1459_v38, %v1554_v21  ;;  %v360_v12 = vrot.slane %v1474_v61, %v1554_v21  ;;  %v475_v14 = vrot.slane %v1490_v23, %v1554_v21 }
0x15a4   :  { %v1015_v63 = vpop.f32.mrf.mxu0  ;;  %v590_v17 = vrot.slane %v1506_v49, %v1554_v21  ;;  %v705_v32 = vrot.slane %v1521_v6, %v1554_v21  ;;  %v820_v25 = vrot.slane %v1536_v29, %v1554_v21  ;;  %v935_v36 = vrot.slane %v927_v55, %v1554_v21 }
0x15a5   :  { %1286 = vpow2.f32 %v1127_v62  ;;  %v253_v11 = vrot.slane %v245_v9, %v1554_v21  ;;  %v368_v16 = vrot.slane %v360_v12, %v1554_v21  ;;  %v483_v38 = vrot.slane %v475_v14, %v1554_v21 }
0x15a6   :  { %v1224_v0 = vpop.f32.mrf.mxu0  ;;  %v598_v22 = vrot.slane %v590_v17, %v1554_v21  ;;  %v713_v24 = vrot.slane %v705_v32, %v1554_v21  ;;  %v828_v34 = vrot.slane %v820_v25, %v1554_v21  ;;  %v943_v6 = vrot.slane %v935_v36, %v1554_v21 }
0x15a7   :  { %v264_v41 = vrot.slane %v253_v11, %v1412_v42  ;;  %v379_v61 = vrot.slane %v368_v16, %v1412_v42  ;;  %v494_v23 = vrot.slane %v483_v38, %v1412_v42  ;;  %v246_v35 = vcombine.high %v245_v9, %v245_v9 }
0x15a8   :  { %v609_v49 = vrot.slane %v598_v22, %v1412_v42  ;;  %v724_v26 = vrot.slane %v713_v24, %v1412_v42  ;;  %v839_v19 = vrot.slane %v828_v34, %v1412_v42  ;;  %v954_v27 = vrot.slane %v943_v6, %v1412_v42 }
0x15a9   :  { %v361_v39 = vcombine.high %v360_v12, %v360_v12  ;;  %v260_v40 = vrot.slane %v246_v35, %v1554_v21  ;;  %v476_v45 = vcombine.high %v475_v14, %v475_v14  ;;  %v591_v48 = vcombine.high %v590_v17, %v590_v17 }
0x15aa   :  { %v821_v56 = vcombine.high %v820_v25, %v820_v25  ;;  %v936_v59 = vcombine.high %v935_v36, %v935_v36 }
0x15ab   :  { %v268_v46 = vrot.slane %v260_v40, %v1412_v42  ;;  %v375_v15 = vrot.slane %v361_v39, %v1554_v21  ;;  %v490_v51 = vrot.slane %v476_v45, %v1554_v21  ;;  %v605_v54 = vrot.slane %v591_v48, %v1554_v21 }
0x15ac   :  { %v835_v62 = vrot.slane %v821_v56, %v1554_v21  ;;  %v950_v0 = vrot.slane %v936_v59, %v1554_v21 }
0x15ad   :  { %v383_v50 = vrot.slane %v375_v15, %v1412_v42  ;;  %v498_v53 = vrot.slane %v490_v51, %v1412_v42  ;;  %v613_v57 = vrot.slane %v605_v54, %v1412_v42 }
0x15ae   :  { %v843_v63 = vrot.slane %v835_v62, %v1412_v42 }
0x15b2   :  { %v1287_v1 = vpop.eup %1286 }
0x15b3   :  { %v1021_v2 = vadd.f32 1.0, %v1287_v1  ;;  %v958_v1 = vrot.slane %v950_v0, %v1412_v42 }
0x15b5   :  { %1288 = vrcp.f32 %v1021_v2 }
0x15c2   :  { %v1549_v3 = vpop.eup %1288 }
0x15c3   :  { %v1024_v18 = vmul.f32 2.0, %v1549_v3  ;;  %v1026_v28 = vmul.f32 %v1549_v3, %v921_v20  ;;  %v706_v20 = vcombine.high %v705_v32, %v705_v32 }
0x15c5   :  { %v1128_v4 = vadd.f32 -1.0, %v1024_v18  ;;  %v720_v58 = vrot.slane %v706_v20, %v1554_v21 }
0x15c7   :  { %1028 = vrot.lane.b32.xlu1 %v1128_v4, %s1317_s4  ;;  %v728_v60 = vrot.slane %v720_v58, %v1412_v42 }
0x1639   :  { %v1029_v10 = vpop.permute.xlu1 %1028 }
0x163a   :  { %v1031_v13 = vmul.f32 %v1549_v3, %v1029_v10 }
0x163c   :  { %1033 = vrot.lane.b32.xlu0 %v1031_v13, %s1318_s10 }
0x1640   :  { %269 = vrot.lane.b32.xlu0 %v264_v41, %s1318_s10 }
0x1644   :  { %384 = vrot.lane.b32.xlu0 %v379_v61, %s1318_s10 }
0x1648   :  { %499 = vrot.lane.b32.xlu0 %v494_v23, %s1318_s10 }
0x164c   :  { %614 = vrot.lane.b32.xlu0 %v609_v49, %s1318_s10 }
0x1650   :  { %729 = vrot.lane.b32.xlu0 %v724_v26, %s1318_s10 }
0x1654   :  { %844 = vrot.lane.b32.xlu0 %v839_v19, %s1318_s10 }
0x1658   :  { %959 = vrot.lane.b32.xlu0 %v954_v27, %s1318_s10 }
0x16ae   :  { %v1034_v29 = vpop.permute.xlu0 %1033 }
0x16af   :  { %v1036_v30 = vadd.f32 %v1034_v29, %v1026_v28 }
0x16b1   :  { %1290 = vtanh.f32 %v1036_v30 }
0x16b2   :  { %v270_v31 = vpop.permute.xlu0 %269 }
0x16b3   :  { %276 = vst.msk [vmem:[#allocation2] sm:$0x1] %vm275_vm6, %v270_v31 }
0x16b6   :  { %v385_v33 = vpop.permute.xlu0 %384 }
0x16b7   :  { %390 = vst.msk [vmem:[#allocation2 + $0x1] sm:$0x1] %vm275_vm6, %v385_v33 }
0x16ba   :  { %v500_v37 = vpop.permute.xlu0 %499 }
0x16bb   :  { %505 = vst.msk [vmem:[#allocation2 + $0x2] sm:$0x1] %vm275_vm6, %v500_v37 }
0x16be   :  { %v1291_v43 = vpop.eup %1290  ;;  %v615_v44 = vpop.permute.xlu0 %614 }
0x16bf   :  { %620 = vst.msk [vmem:[#allocation2 + $0x3] sm:$0x1] %vm275_vm6, %v615_v44  ;;  %1039 = vrot.lane.b32.xlu1 %v1291_v43, %s1317_s4 }
0x16c2   :  { %v730_v47 = vpop.permute.xlu0 %729 }
0x16c3   :  { %735 = vst.msk [vmem:[#allocation2 + $0x4] sm:$0x1] %vm275_vm6, %v730_v47  ;;  %271 = vrot.lane.b32.xlu1 %v268_v46, %s1318_s10 }
0x16c6   :  { %v845_v52 = vpop.permute.xlu0 %844 }
0x16c7   :  { %850 = vst.msk [vmem:[#allocation2 + $0x5] sm:$0x1] %vm275_vm6, %v845_v52  ;;  %386 = vrot.lane.b32.xlu1 %v383_v50, %s1318_s10 }
0x16ca   :  { %v960_v55 = vpop.permute.xlu0 %959 }
0x16cb   :  { %965 = vst.msk [vmem:[#allocation2 + $0x6] sm:$0x1] %vm275_vm6, %v960_v55  ;;  %501 = vrot.lane.b32.xlu1 %v498_v53, %s1318_s10 }
0x16cf   :  { %616 = vrot.lane.b32.xlu1 %v613_v57, %s1318_s10 }
0x16d3   :  { %731 = vrot.lane.b32.xlu1 %v728_v60, %s1318_s10 }
0x16d7   :  { %846 = vrot.lane.b32.xlu1 %v843_v63, %s1318_s10 }
0x16db   :  { %961 = vrot.lane.b32.xlu1 %v958_v1, %s1318_s10 }
0x1731   :  { %v1040_v2 = vpop.permute.xlu1 %1039 }
0x1732   :  { %v1042_v18 = vmul.f32 %v1549_v3, %v1040_v2 }
0x1734   :  { %v1050_v4 = vrot.slane %v1042_v18, %v1554_v21 }
0x1735   :  { %v272_v5 = vpop.permute.xlu1 %271 }
0x1736   :  { %v1051_v7 = vcombine.high %v1050_v4, %v1050_v4  ;;  %v1058_v8 = vrot.slane %v1050_v4, %v1554_v21  ;;  %277 = vst.msk [vmem:[#allocation2 + $0x8] sm:$0x1] %vm275_vm6, %v272_v5 }
0x1738   :  { %v1069_v9 = vrot.slane %v1058_v8, %v1412_v42  ;;  %v1065_v10 = vrot.slane %v1051_v7, %v1554_v21 }
0x1739   :  { %v387_v11 = vpop.permute.xlu1 %386 }
0x173a   :  { %391 = vst.msk [vmem:[#allocation2 + $0x9] sm:$0x1] %vm275_vm6, %v387_v11  ;;  %1074 = vrot.lane.b32.xlu0 %v1069_v9, %s1318_s10  ;;  %v1073_v12 = vrot.slane %v1065_v10, %v1412_v42 }
0x173c   :  { %1076 = vrot.lane.b32.xlu1 %v1073_v12, %s1318_s10 }
0x173d   :  { %v502_v3 = vpop.permute.xlu1 %501 }
0x173e   :  { %506 = vst.msk [vmem:[#allocation2 + $0xa] sm:$0x1] %vm275_vm6, %v502_v3 }
0x1741   :  { %v617_v13 = vpop.permute.xlu1 %616 }
0x1742   :  { %621 = vst.msk [vmem:[#allocation2 + $0xb] sm:$0x1] %vm275_vm6, %v617_v13 }
0x1745   :  { %v732_v16 = vpop.permute.xlu1 %731 }
0x1746   :  { %736 = vst.msk [vmem:[#allocation2 + $0xc] sm:$0x1] %vm275_vm6, %v732_v16 }
0x1749   :  { %v847_v14 = vpop.permute.xlu1 %846 }
0x174a   :  { %851 = vst.msk [vmem:[#allocation2 + $0xd] sm:$0x1] %vm275_vm6, %v847_v14 }
0x174d   :  { %v962_v21 = vpop.permute.xlu1 %961 }
0x174e   :  { %966 = vst.msk [vmem:[#allocation2 + $0xe] sm:$0x1] %vm275_vm6, %v962_v21 }
0x17ac   :  { %v1075_v42 = vpop.permute.xlu0 %1074 }
0x17ad   :  { %1080 = vst.msk [vmem:[#allocation2 + $0x7] sm:$0x1] %vm275_vm6, %v1075_v42 }
0x17ae   :  { %v1077_v41 = vpop.permute.xlu1 %1076 }
0x17af   :  { %1081 = vst.msk [vmem:[#allocation2 + $0xf] sm:$0x1] %vm275_vm6, %v1077_v41 }
0x17b0   :  { %1303 = shalt.err (!%p1300_p4)
}
0x17b1   :  { %s1321_s14 = smov 128   ;;  %s1322_s15 = smov 8  }
0x17b2   :  { %1095 = dma.vmem_to_hbm [thread:$0]  %s1090_s12, 256, %s1648_s6, [#allocation3], %s1321_s14, %s1321_s14, %s1322_s15  }
0x17b3   :  { %1312 = dma.done.wait [#allocation3], 256  }
0x17b4   :  { %1313 = vsyncadd [#allocation3], 4294967040 }
0x17b5   :  { %1101 = vsyncpa [#allocation3], 1 }

</bundles_post_ra>
